<compile_context>
chip_gen: v7x
topology: tpu7x:2x2x1
jax: 0.10.0
libtpu: 0.0.40
codegen_flags: <defaults>
</compile_context>

<pallas_src>
import jax
import jax.numpy as jnp
from jax.experimental import pallas as pl
from jax.experimental.pallas import tpu as pltpu


def _round_up(x, m):
    return (x + m - 1) // m * m


def make_actor_kernel(action_low, action_high, compute_dtype=jnp.float32):
    """Close over the (static) action bounds so they fold into immediate VPU ops."""
    low = float(action_low)
    high = float(action_high)
    half_scale = 0.5 * (high - low)
    mid = low + half_scale

    def actor_kernel(state_ref,                 # VMEM: [TB, S]
                     w1_ref, b1_ref,            # VMEM: [S,  Hp], [1, Hp]
                     w3_ref, b3_ref,            # VMEM: [Hp, Hp], [1, Hp]
                     wa_ref, ba_ref,            # VMEM: [Hp, Ap], [1, Ap]
                     out_ref):                  # VMEM: [TB, Ap]
        x = state_ref[...].astype(compute_dtype)

        # layer1 + tanh
        h1 = jnp.tanh(
            jnp.dot(x, w1_ref[...].astype(compute_dtype),
                    preferred_element_type=jnp.float32) + b1_ref[...]
        )
        # layer3 + tanh  (layer2 exists in the PyTorch module but is never used in forward)
        h3 = jnp.tanh(
            jnp.dot(h1.astype(compute_dtype), w3_ref[...].astype(compute_dtype),
                    preferred_element_type=jnp.float32) + b3_ref[...]
        )
        # action head
        a = jnp.dot(h3.astype(compute_dtype), wa_ref[...].astype(compute_dtype),
                    preferred_element_type=jnp.float32) + ba_ref[...]
        # low + (high - low) * sigmoid(a)  ==  mid + half_scale * tanh(0.5 * a)
        # (one EUP tanh instead of exp + divide)
        out_ref[...] = mid + half_scale * jnp.tanh(0.5 * a)

    return actor_kernel


def init_actor_params(key, state_size, action_size, hidden=100):
    """Deterministic init mimicking nn.Linear default (uniform +/- 1/sqrt(fan_in)).
    Weights stored already transposed to [in, out]; biases as [1, out]."""
    ks = jax.random.split(key, 6)

    def lin(kw, kb, fan_in, fan_out):
        bound = 1.0 / jnp.sqrt(fan_in)
        w = jax.random.uniform(kw, (fan_in, fan_out), jnp.float32, -bound, bound)
        b = jax.random.uniform(kb, (1, fan_out), jnp.float32, -bound, bound)
        return w, b

    w1, b1 = lin(ks[0], ks[1], state_size, hidden)
    # layer2 params exist in the PyTorch module but are unused in forward; skipped here.
    w3, b3 = lin(ks[2], ks[3], hidden, hidden)
    wa, ba = lin(ks[4], ks[5], hidden, action_size)
    return {"w1": w1, "b1": b1, "w3": w3, "b3": b3, "wa": wa, "ba": ba}


def prepare_actor_params(params, state_size, action_size, hidden=100):
    """One-time padding of weights/biases to lane-dense (128) hidden/action dims.
    Zero-padding keeps the math exact: tanh(0)=0 and zero rows/cols contribute nothing.
    The state dim is deliberately left unpadded."""
    S = state_size
    Hp = _round_up(hidden, 128)        # 100 -> 128
    Ap = _round_up(action_size, 128)   # 4   -> 128
    f32 = jnp.float32
    padded = {
        "w1": jnp.zeros((S, Hp), f32).at[:, :hidden].set(params["w1"]),
        "b1": jnp.zeros((1, Hp), f32).at[:, :hidden].set(params["b1"]),
        "w3": jnp.zeros((Hp, Hp), f32).at[:hidden, :hidden].set(params["w3"]),
        "b3": jnp.zeros((1, Hp), f32).at[:, :hidden].set(params["b3"]),
        "wa": jnp.zeros((Hp, Ap), f32).at[:hidden, :action_size].set(params["wa"]),
        "ba": jnp.zeros((1, Ap), f32).at[:, :action_size].set(params["ba"]),
    }
    padded = jax.block_until_ready(padded)   # materialize once, outside the hot path
    padded["action_size"] = action_size      # plain Python int, for the output slice
    return padded


def actor_forward(state, padded_params, action_range,
                  compute_dtype=jnp.float32, block_cap=512):
    """state: [B, state_size] f32. padded_params: output of prepare_actor_params.

    Batch-gridded single-block kernel with VMEM-resident weights; the real [B, A]
    result is sliced out outside the kernel (free XLA work).
    """
    B, S = state.shape
    f32 = jnp.float32
    state = state.astype(f32)

    Hp = padded_params["w1"].shape[1]
    Ap = padded_params["wa"].shape[1]
    A = padded_params["action_size"]

    # Batch tiling: >=2 grid steps when B > 8 (keeps both v7x TCs busy), cap rows/step
    # at block_cap, and pick block_b to minimize batch padding.
    Bp8 = _round_up(B, 8)
    n_steps = max(2 if Bp8 > 8 else 1, pl.cdiv(Bp8, block_cap))
    block_b = _round_up(pl.cdiv(Bp8, n_steps), 8)
    Bp = block_b * n_steps

    if Bp != B:
        state_p = jnp.zeros((Bp, S), f32).at[:B, :].set(state)
    else:
        state_p = state

    kernel = make_actor_kernel(*action_range, compute_dtype=compute_dtype)

    # Weights/biases: full-array blocks, index_map always (0, 0) -> resident across grid.
    resident = lambda shape: pl.BlockSpec(shape, lambda i: (0, 0))

    out_padded = pl.pallas_call(
        kernel,
        out_shape=jax.ShapeDtypeStruct((Bp, Ap), f32),
        grid=(n_steps,),
        in_specs=[
            pl.BlockSpec((block_b, S), lambda i: (i, 0)),    # state tile walks the batch
            resident((S, Hp)), resident((1, Hp)),            # w1, b1
            resident((Hp, Hp)), resident((1, Hp)),           # w3, b3
            resident((Hp, Ap)), resident((1, Ap)),           # wa, ba
        ],
        out_specs=pl.BlockSpec((block_b, Ap), lambda i: (i, 0)),
        compiler_params=pltpu.CompilerParams(
            dimension_semantics=("parallel",),               # shards batch across TCs on v7x
        ),
    )(state_p,
      padded_params["w1"], padded_params["b1"],
      padded_params["w3"], padded_params["b3"],
      padded_params["wa"], padded_params["ba"])

    # Slice away batch/action padding outside the kernel.
    return out_padded[:B, :A]


def actor_reference(state, params, action_range):
    """Pure-JAX reference for correctness check (uses the unpadded params)."""
    low, high = action_range
    h1 = jnp.tanh(state @ params["w1"] + params["b1"])
    h3 = jnp.tanh(h1 @ params["w3"] + params["b3"])
    a = h3 @ params["wa"] + params["ba"]
    return low + (high - low) * jax.nn.sigmoid(a)


if __name__ == "__main__":
    key = jax.random.PRNGKey(0)
    k_state, k_params = jax.random.split(key)

    B, state_size, action_size = 8, 16, 4
    action_range = (-2.0, 2.0)

    state = jax.random.normal(k_state, (B, state_size), dtype=jnp.float32)
    params = init_actor_params(k_params, state_size, action_size)
    padded_params = prepare_actor_params(params, state_size, action_size)

    out = actor_forward(state, padded_params, action_range)
    out = jax.block_until_ready(out)

    ref = actor_reference(state, params, action_range)
    assert out.shape == (B, action_size)
    assert jnp.allclose(out, ref, atol=1e-5, rtol=1e-5), "mismatch vs reference"

    # Also exercise a multi-step grid (2 grid steps on the parallel batch axis).
    B2 = 40
    state2 = jax.random.normal(jax.random.PRNGKey(3), (B2, state_size), dtype=jnp.float32)
    out2 = jax.block_until_ready(actor_forward(state2, padded_params, action_range))
    ref2 = actor_reference(state2, params, action_range)
    assert out2.shape == (B2, action_size)
    assert jnp.allclose(out2, ref2, atol=1e-5, rtol=1e-5), "mismatch vs reference (B=40)"

    print("KERNEL_OK")
</pallas_src>

<mosaic_0001>
module attributes {stable_mosaic.version = 11 : i64} {
  func.func @actor_kernel(%arg0: i32, %arg1: memref<8x16xf32, #tpu.memory_space<vmem>>, %arg2: memref<16x128xf32, #tpu.memory_space<vmem>>, %arg3: memref<1x128xf32, #tpu.memory_space<vmem>>, %arg4: memref<128x128xf32, #tpu.memory_space<vmem>>, %arg5: memref<1x128xf32, #tpu.memory_space<vmem>>, %arg6: memref<128x128xf32, #tpu.memory_space<vmem>>, %arg7: memref<1x128xf32, #tpu.memory_space<vmem>>, %arg8: memref<8x128xf32, #tpu.memory_space<vmem>>) attributes {dimension_semantics = [#tpu.dimension_semantics<parallel>], iteration_bounds = array<i64: 1>, scalar_prefetch = 0 : i64, scratch_operands = 0 : i64, tpu.core_type = #tpu.core_type<tc>, window_params = [{transform_indices = @transform_0, window_bounds = array<i64: 8, 16>}, {pipeline_mode = #tpu.pipeline_mode<synchronous>, transform_indices = @transform_1, window_bounds = array<i64: 16, 128>}, {pipeline_mode = #tpu.pipeline_mode<synchronous>, transform_indices = @transform_2, window_bounds = array<i64: 1, 128>}, {pipeline_mode = #tpu.pipeline_mode<synchronous>, transform_indices = @transform_3, window_bounds = array<i64: 128, 128>}, {pipeline_mode = #tpu.pipeline_mode<synchronous>, transform_indices = @transform_4, window_bounds = array<i64: 1, 128>}, {pipeline_mode = #tpu.pipeline_mode<synchronous>, transform_indices = @transform_5, window_bounds = array<i64: 128, 128>}, {pipeline_mode = #tpu.pipeline_mode<synchronous>, transform_indices = @transform_6, window_bounds = array<i64: 1, 128>}, {transform_indices = @transform_7, window_bounds = array<i64: 8, 128>}]} {
    %c0 = arith.constant 0 : index
    %c0_0 = arith.constant 0 : index
    %0 = vector.load %arg1[%c0, %c0_0] : memref<8x16xf32, #tpu.memory_space<vmem>>, vector<8x16xf32>
    %c0_1 = arith.constant 0 : index
    %c0_2 = arith.constant 0 : index
    %1 = vector.load %arg2[%c0_1, %c0_2] : memref<16x128xf32, #tpu.memory_space<vmem>>, vector<16x128xf32>
    %cst = arith.constant dense<0.000000e+00> : vector<8x128xf32>
    %2 = tpu.matmul %0, %1, %cst {dimension_numbers = #tpu.dot_dimension_numbers<[1], [0], [0], [1], [0, 0, 1, 1], [], []>} : vector<8x16xf32>, vector<16x128xf32>, vector<8x128xf32> -> vector<8x128xf32>
    %c0_3 = arith.constant 0 : index
    %c0_4 = arith.constant 0 : index
    %3 = vector.load %arg3[%c0_3, %c0_4] : memref<1x128xf32, #tpu.memory_space<vmem>>, vector<1x128xf32>
    %4 = vector.broadcast %3 : vector<1x128xf32> to vector<8x128xf32>
    %5 = arith.addf %2, %4 : vector<8x128xf32>
    %6 = math.tanh %5 : vector<8x128xf32>
    %c0_5 = arith.constant 0 : index
    %c0_6 = arith.constant 0 : index
    %7 = vector.load %arg4[%c0_5, %c0_6] : memref<128x128xf32, #tpu.memory_space<vmem>>, vector<128x128xf32>
    %cst_7 = arith.constant dense<0.000000e+00> : vector<8x128xf32>
    %8 = tpu.matmul %6, %7, %cst_7 {dimension_numbers = #tpu.dot_dimension_numbers<[1], [0], [0], [1], [0, 0, 1, 1], [], []>} : vector<8x128xf32>, vector<128x128xf32>, vector<8x128xf32> -> vector<8x128xf32>
    %c0_8 = arith.constant 0 : index
    %c0_9 = arith.constant 0 : index
    %9 = vector.load %arg5[%c0_8, %c0_9] : memref<1x128xf32, #tpu.memory_space<vmem>>, vector<1x128xf32>
    %10 = vector.broadcast %9 : vector<1x128xf32> to vector<8x128xf32>
    %11 = arith.addf %8, %10 : vector<8x128xf32>
    %12 = math.tanh %11 : vector<8x128xf32>
    %c0_10 = arith.constant 0 : index
    %c0_11 = arith.constant 0 : index
    %13 = vector.load %arg6[%c0_10, %c0_11] : memref<128x128xf32, #tpu.memory_space<vmem>>, vector<128x128xf32>
    %cst_12 = arith.constant dense<0.000000e+00> : vector<8x128xf32>
    %14 = tpu.matmul %12, %13, %cst_12 {dimension_numbers = #tpu.dot_dimension_numbers<[1], [0], [0], [1], [0, 0, 1, 1], [], []>} : vector<8x128xf32>, vector<128x128xf32>, vector<8x128xf32> -> vector<8x128xf32>
    %c0_13 = arith.constant 0 : index
    %c0_14 = arith.constant 0 : index
    %15 = vector.load %arg7[%c0_13, %c0_14] : memref<1x128xf32, #tpu.memory_space<vmem>>, vector<1x128xf32>
    %16 = vector.broadcast %15 : vector<1x128xf32> to vector<8x128xf32>
    %17 = arith.addf %14, %16 : vector<8x128xf32>
    %cst_15 = arith.constant 5.000000e-01 : f32
    %18 = vector.broadcast %cst_15 : f32 to vector<8x128xf32>
    %19 = arith.mulf %18, %17 : vector<8x128xf32>
    %20 = math.tanh %19 : vector<8x128xf32>
    %cst_16 = arith.constant 2.000000e+00 : f32
    %21 = vector.broadcast %cst_16 : f32 to vector<8x128xf32>
    %22 = arith.mulf %21, %20 : vector<8x128xf32>
    %cst_17 = arith.constant 0.000000e+00 : f32
    %23 = vector.broadcast %cst_17 : f32 to vector<8x128xf32>
    %24 = arith.addf %23, %22 : vector<8x128xf32>
    %c0_18 = arith.constant 0 : index
    %c0_19 = arith.constant 0 : index
    %25 = vector.load %arg8[%c0_18, %c0_19] : memref<8x128xf32, #tpu.memory_space<vmem>>, vector<8x128xf32>
    tpu.vector_store %arg8[%c0_18, %c0_19], %24 {strides = array<i32>} : memref<8x128xf32, #tpu.memory_space<vmem>>, vector<8x128xf32>,
    return
  }
  func.func @transform_0(%arg0: i32) -> (i32, i32) {
    %c0_i32 = arith.constant 0 : i32
    %c0_i32_0 = arith.constant 0 : i32
    return %arg0, %c0_i32 : i32, i32
  }
  func.func @transform_1(%arg0: i32) -> (i32, i32) {
    %c0_i32 = arith.constant 0 : i32
    %c0_i32_0 = arith.constant 0 : i32
    %c0_i32_1 = arith.constant 0 : i32
    return %c0_i32, %c0_i32_0 : i32, i32
  }
  func.func @transform_2(%arg0: i32) -> (i32, i32) {
    %c0_i32 = arith.constant 0 : i32
    %c0_i32_0 = arith.constant 0 : i32
    %c0_i32_1 = arith.constant 0 : i32
    return %c0_i32, %c0_i32_0 : i32, i32
  }
  func.func @transform_3(%arg0: i32) -> (i32, i32) {
    %c0_i32 = arith.constant 0 : i32
    %c0_i32_0 = arith.constant 0 : i32
    %c0_i32_1 = arith.constant 0 : i32
    return %c0_i32, %c0_i32_0 : i32, i32
  }
  func.func @transform_4(%arg0: i32) -> (i32, i32) {
    %c0_i32 = arith.constant 0 : i32
    %c0_i32_0 = arith.constant 0 : i32
    %c0_i32_1 = arith.constant 0 : i32
    return %c0_i32, %c0_i32_0 : i32, i32
  }
  func.func @transform_5(%arg0: i32) -> (i32, i32) {
    %c0_i32 = arith.constant 0 : i32
    %c0_i32_0 = arith.constant 0 : i32
    %c0_i32_1 = arith.constant 0 : i32
    return %c0_i32, %c0_i32_0 : i32, i32
  }
  func.func @transform_6(%arg0: i32) -> (i32, i32) {
    %c0_i32 = arith.constant 0 : i32
    %c0_i32_0 = arith.constant 0 : i32
    %c0_i32_1 = arith.constant 0 : i32
    return %c0_i32, %c0_i32_0 : i32, i32
  }
  func.func @transform_7(%arg0: i32) -> (i32, i32) {
    %c0_i32 = arith.constant 0 : i32
    %c0_i32_0 = arith.constant 0 : i32
    return %arg0, %c0_i32 : i32, i32
  }
}

</mosaic_0001>

<bundles_post_ra>
// kernel: tpu_custom_call.1
= control target key start
LH: loop header
LB: loop body
LE: loop exit
PB: predicated region body
PF: predicated region fallthrough
CT: control target
= control target key end

     0   :  { %12 = vsyncpa [#allocation3], 0  ;;  %s825_s0 = inlined_call_operand.hbm [shape: f32[8,16], index: 0, kind: input, shape index: {}]   ;;  %s826_s1 = inlined_call_operand.hbm [shape: f32[16,128], index: 1, kind: input, shape index: {}]   ;;  %s827_s2 = inlined_call_operand.vmem [shape: f32[1,128], index: 2, kind: input, shape index: {}]   ;;  %s828_s3 = inlined_call_operand.hbm [shape: f32[128,128], index: 3, kind: input, shape index: {}]   ;;  %s829_s4 = inlined_call_operand.vmem [shape: f32[1,128], index: 4, kind: input, shape index: {}]   ;;  %s830_s5 = inlined_call_operand.hbm [shape: f32[128,128], index: 5, kind: input, shape index: {}]   ;;  %s831_s6 = inlined_call_operand.vmem [shape: f32[1,128], index: 6, kind: input, shape index: {}]   ;;  %s832_s7 = inlined_call_operand.hbm [shape: f32[8,128], index: 7, kind: output, shape index: {}]  }
   0x1   :  { %13 = vsyncpa [#allocation6], 0 }
   0x2   :  { %14 = vsyncpa [#allocation9], 0 }
   0x3   :  { %15 = vsyncpa [#allocation4], 0  ;;  %s677_s24 = smov [#allocation5]   ;;  %s559_s28 = scalar_lea.hbm %s826_s1, 256 }
   0x4   :  { %s31_s25 = sshll.u32 %s677_s24, 4  ;;  %p560_p0 = scmp.ne.s32.totalorder %s826_s1, %s559_s28  ;;  %s32_s25 = int_to_ptr.vmem [resolvable:$true] %s31_s25 }
   0x5   :  { %p563_p1 = scmp.lt.u32.totalorder %s559_s28, %s826_s1 }
   0x7   :  { %p565_p2 = pnand %p563_p1, %p560_p0 }
   0x9   :  { %568 = shalt.err (!%p565_p2)
}
   0xa   :  { %s569_s10 = scalar_lea.vmem %s32_s25, 256  ;;  %p574_p4 = scmp.lt.s32.totalorder %s32_s25, %s32_s25 }
   0xb   :  { %p570_p3 = scmp.ne.s32.totalorder %s32_s25, %s569_s10  ;;  %p575_p5 = scmp.lt.s32.totalorder %s569_s10, %s569_s10 }
   0xd   :  { %p576_p6 = por %p575_p5, %p574_p4 }
   0xf   :  { %p577_p7 = pnand %p576_p6, %p570_p3 }
  0x11   :  { %580 = shalt.err (!%p577_p7)
}
  0x12   :  { %s678_s11 = smov 128   ;;  %s679_s12 = smov 8  }
  0x13   :  { %37 = dma.hbm_to_vmem [thread:$0]  %s826_s1, 256, %s32_s25, [#allocation6], %s678_s11, %s678_s11, %s679_s12  }
  0x14   :  { %s680_s15 = smov [#allocation2]   ;;  %s681_s17 = smov [#allocation7]  }
  0x15   :  { %s22_s16 = sshll.u32 %s680_s15, 4  ;;  %s45_s18 = sshll.u32 %s681_s17, 4  ;;  %s23_s16 = int_to_ptr.vmem [resolvable:$true] %s22_s16  ;;  %s46_s18 = int_to_ptr.vmem [resolvable:$true] %s45_s18 }
  0x16   :  { %s581_s21 = scalar_lea.hbm %s825_s0, 128 }
  0x17   :  { %p582_p8 = scmp.ne.s32.totalorder %s825_s0, %s581_s21  ;;  %p585_p9 = scmp.lt.u32.totalorder %s581_s21, %s825_s0 }
  0x19   :  { %p587_p10 = pnand %p585_p9, %p582_p8 }
  0x1b   :  { %590 = shalt.err (!%p587_p10)
}
  0x1c   :  { %s591_s1 = scalar_lea.vmem %s23_s16, 128  ;;  %p596_p12 = scmp.lt.s32.totalorder %s23_s16, %s23_s16 }
  0x1d   :  { %p592_p11 = scmp.ne.s32.totalorder %s23_s16, %s591_s1  ;;  %p597_p13 = scmp.lt.s32.totalorder %s591_s1, %s591_s1 }
  0x1f   :  { %p598_p0 = por %p597_p13, %p596_p12 }
  0x21   :  { %p599_p1 = pnand %p598_p0, %p592_p11 }
  0x23   :  { %602 = shalt.err (!%p599_p1)
}
  0x24   :  { %25 = dma.hbm_to_vmem [thread:$0]  %s825_s0, 128, %s23_s16, [#allocation3]  }
  0x25   :  { %s603_s30 = scalar_lea.hbm %s828_s3, 2048 }
  0x26   :  { %p604_p2 = scmp.ne.s32.totalorder %s828_s3, %s603_s30  ;;  %p607_p3 = scmp.lt.u32.totalorder %s603_s30, %s828_s3 }
  0x28   :  { %p609_p4 = pnand %p607_p3, %p604_p2 }
  0x2a   :  { %612 = shalt.err (!%p609_p4)
}
  0x2b   :  { %s613_s14 = scalar_lea.vmem %s46_s18, 2048  ;;  %p618_p6 = scmp.lt.s32.totalorder %s46_s18, %s46_s18 }
  0x2c   :  { %p614_p5 = scmp.ne.s32.totalorder %s46_s18, %s613_s14  ;;  %p619_p7 = scmp.lt.s32.totalorder %s613_s14, %s613_s14 }
  0x2e   :  { %p620_p8 = por %p619_p7, %p618_p6 }
  0x30   :  { %p621_p9 = pnand %p620_p8, %p614_p5 }
  0x32   :  { %624 = shalt.err (!%p621_p9)
}
  0x33   :  { %51 = dma.hbm_to_vmem [thread:$0]  %s828_s3, 2048, %s46_s18, [#allocation6], %s678_s11, %s678_s11, %s679_s12  }
  0x34   :  { %s682_s16 = smov [#allocation8]   ;;  %s625_s21 = scalar_lea.hbm %s830_s5, 2048 }
  0x35   :  { %s59_s17 = sshll.u32 %s682_s16, 4  ;;  %p626_p10 = scmp.ne.s32.totalorder %s830_s5, %s625_s21  ;;  %s60_s17 = int_to_ptr.vmem [resolvable:$true] %s59_s17 }
  0x36   :  { %p629_p11 = scmp.lt.u32.totalorder %s625_s21, %s830_s5 }
  0x38   :  { %p631_p12 = pnand %p629_p11, %p626_p10 }
  0x3a   :  { %634 = shalt.err (!%p631_p12)
}
  0x3b   :  { %s635_s1 = scalar_lea.vmem %s60_s17, 2048  ;;  %p640_p0 = scmp.lt.s32.totalorder %s60_s17, %s60_s17 }
  0x3c   :  { %p636_p13 = scmp.ne.s32.totalorder %s60_s17, %s635_s1  ;;  %p641_p1 = scmp.lt.s32.totalorder %s635_s1, %s635_s1 }
  0x3e   :  { %p642_p2 = por %p641_p1, %p640_p0 }
  0x40   :  { %p643_p3 = pnand %p642_p2, %p636_p13 }
  0x42   :  { %646 = shalt.err (!%p643_p3)
}
  0x43   :  { %65 = dma.hbm_to_vmem [thread:$0]  %s830_s5, 2048, %s60_s17, [#allocation9], %s678_s11, %s678_s11, %s679_s12  }
  0x44   :  { %669 = dma.done.wait [#allocation3], 128  }
  0x45   :  { %670 = vsyncadd [#allocation3], 4294967168 }
  0x46   :  { %671 = dma.done.wait [#allocation6], 2304  }
  0x47   :  { %672 = vsyncadd [#allocation6], 4294964992 }
  0x48   :  { %673 = dma.done.wait [#allocation9], 2048  }
  0x49   :  { %674 = vsyncadd [#allocation9], 4294965248  ;;  %v683_v0 = vmov 0.0|0.0   ;;  %vm684_vm0 = vmmov 0   ;;  %v685_v1 = vmov 0.0   ;;  %v81_v2 = vld [vmem:[#allocation5] sm:$0xff] }
  0x4a   :  { %492 = vmatprep.subr.bf16.mxu0 %v683_v0  ;;  %419 = vmatprep.mubr.msk.f32.mxu0 %vm684_vm0, %v685_v1  ;;  %v82_v3 = vld [vmem:[#allocation5 + $0x8] sm:$0xff]  ;;  %v165_v5 = vld [vmem:[#allocation7] sm:$0xff]  ;;  %v166_v6 = vld [vmem:[#allocation7 + $0x8] sm:$0xff]  ;;  %vm90_vm1 = vcmask 130048   ;;  %s686_s28 = smov [#allocation10]  }
  0x4b   :  { %495 = vmatprep.subr.bf16.mxu1 %v683_v0  ;;  %454 = vmatprep.mubr.msk.f32.mxu1 %vm684_vm0, %v685_v1  ;;  %v493_v4 = vpack.c.bf16 %v82_v3, %v81_v2  ;;  %v167_v7 = vld [vmem:[#allocation7 + $0x10] sm:$0xff]  ;;  %v496_v8 = vpack.c.bf16 %v166_v6, %v165_v5  ;;  %v168_v9 = vld [vmem:[#allocation7 + $0x18] sm:$0xff]  ;;  %v80_v10 = vld [vmem:[#allocation2] sm:$0xff]  ;;  %s363_s29 = sshll.u32 %s686_s28, 4  ;;  %s364_s29 = int_to_ptr.vmem [resolvable:$true] %s363_s29 }
  0x4c   :  { %v499_v11 = vpack.c.bf16 %v168_v9, %v167_v7  ;;  %v169_v12 = vld [vmem:[#allocation7 + $0x20] sm:$0xff]  ;;  %v170_v13 = vld [vmem:[#allocation7 + $0x28] sm:$0xff]  ;;  %v171_v15 = vld [vmem:[#allocation7 + $0x30] sm:$0xff]  ;;  %p652_p5 = scmp.lt.s32.totalorder %s364_s29, %s364_s29 }
  0x4d   :  { %494 = vmatpush3.bf16.msra.mxu0 %v493_v4  ;;  %497 = vmatpush3.bf16.msra.mxu1 %v496_v8  ;;  %v502_v14 = vpack.c.bf16 %v170_v13, %v169_v12  ;;  %v172_v16 = vld [vmem:[#allocation7 + $0x38] sm:$0xff]  ;;  %v173_v18 = vld [vmem:[#allocation7 + $0x40] sm:$0xff]  ;;  %v174_v19 = vld [vmem:[#allocation7 + $0x48] sm:$0xff] }
  0x4e   :  { %519 = vmatprep.subr.bf16.mxu0 %v683_v0  ;;  %498 = vmatprep.subr.bf16.mxu1 %v683_v0  ;;  %v505_v17 = vpack.c.bf16 %v172_v16, %v171_v15  ;;  %v508_v20 = vpack.c.bf16 %v174_v19, %v173_v18  ;;  %v175_v21 = vld [vmem:[#allocation7 + $0x50] sm:$0xff]  ;;  %v176_v22 = vld [vmem:[#allocation7 + $0x58] sm:$0xff]  ;;  %v177_v24 = vld [vmem:[#allocation7 + $0x60] sm:$0xff] }
  0x4f   :  { %v511_v23 = vpack.c.bf16 %v176_v22, %v175_v21  ;;  %v178_v25 = vld [vmem:[#allocation7 + $0x68] sm:$0xff]  ;;  %v179_v27 = vld [vmem:[#allocation7 + $0x70] sm:$0xff]  ;;  %v180_v28 = vld [vmem:[#allocation7 + $0x78] sm:$0xff] }
  0x50   :  { %420 = vmatmul.mubr.msk.f32.vlgmr.msra.gmra.mrb[0].mxu0 %vm90_vm1, %v80_v10  ;;  %v514_v26 = vpack.c.bf16 %v178_v25, %v177_v24  ;;  %v517_v29 = vpack.c.bf16 %v180_v28, %v179_v27  ;;  %v259_v30 = vld [vmem:[#allocation8] sm:$0xff]  ;;  %v260_v31 = vld [vmem:[#allocation8 + $0x8] sm:$0xff]  ;;  %v261_v32 = vld [vmem:[#allocation8 + $0x10] sm:$0xff] }
  0x51   :  { %489 = vmatprep.mubr.msk.f32.mxu0 %vm684_vm0, %v685_v1  ;;  %500 = vmatpush3.bf16.msra.mxu1 %v499_v11  ;;  %v520_v33 = vpack.c.bf16 %v260_v31, %v259_v30  ;;  %v262_v34 = vld [vmem:[#allocation8 + $0x18] sm:$0xff]  ;;  %v263_v36 = vld [vmem:[#allocation8 + $0x20] sm:$0xff]  ;;  %v264_v37 = vld [vmem:[#allocation8 + $0x28] sm:$0xff] }
  0x52   :  { %501 = vmatprep.subr.bf16.mxu1 %v683_v0  ;;  %v523_v35 = vpack.c.bf16 %v262_v34, %v261_v32  ;;  %v526_v38 = vpack.c.bf16 %v264_v37, %v263_v36  ;;  %v265_v39 = vld [vmem:[#allocation8 + $0x30] sm:$0xff]  ;;  %v266_v40 = vld [vmem:[#allocation8 + $0x38] sm:$0xff]  ;;  %v267_v42 = vld [vmem:[#allocation8 + $0x40] sm:$0xff] }
  0x53   :  { %521 = vmatpush3.bf16.msra.mxu0 %v520_v33  ;;  %v529_v41 = vpack.c.bf16 %v266_v40, %v265_v39  ;;  %v268_v43 = vld [vmem:[#allocation8 + $0x48] sm:$0xff]  ;;  %v269_v50 = vld [vmem:[#allocation8 + $0x50] sm:$0xff]  ;;  %v270_v51 = vld [vmem:[#allocation8 + $0x58] sm:$0xff] }
  0x54   :  { %522 = vmatprep.subr.bf16.mxu0 %v683_v0  ;;  %v532_v44 = vpack.c.bf16 %v268_v43, %v267_v42  ;;  %v374_v45 = vld [vmem:[%s827_s2] ss:$0 sm:$0xff]  ;;  %v535_v52 = vpack.c.bf16 %v270_v51, %v269_v50  ;;  %v271_v53 = vld [vmem:[#allocation8 + $0x60] sm:$0xff]  ;;  %v273_v56 = vld [vmem:[#allocation8 + $0x70] sm:$0xff] }
  0x55   :  { %503 = vmatpush3.bf16.msra.mxu1 %v502_v14  ;;  %v272_v54 = vld [vmem:[#allocation8 + $0x68] sm:$0xff]  ;;  %v274_v57 = vld [vmem:[#allocation8 + $0x78] sm:$0xff] }
  0x56   :  { %504 = vmatprep.subr.bf16.mxu1 %v683_v0  ;;  %v538_v55 = vpack.c.bf16 %v272_v54, %v271_v53  ;;  %v541_v58 = vpack.c.bf16 %v274_v57, %v273_v56  ;;  %v376_v59 = vld [vmem:[%s829_s4] ss:$0 sm:$0xff]  ;;  %s647_s4 = scalar_lea.vmem %s364_s29, 128 }
  0x57   :  { %524 = vmatpush3.bf16.msra.mxu0 %v523_v35  ;;  %v377_v1 = vld [vmem:[%s831_s6] ss:$0 sm:$0xff]  ;;  %p648_p4 = scmp.ne.s32.totalorder %s364_s29, %s647_s4  ;;  %p653_p6 = scmp.lt.s32.totalorder %s647_s4, %s647_s4 }
  0x58   :  { %525 = vmatprep.subr.bf16.mxu0 %v683_v0 }
  0x59   :  { %506 = vmatpush3.bf16.msra.mxu1 %v505_v17  ;;  %p654_p7 = por %p653_p6, %p652_p5 }
  0x5a   :  { %507 = vmatprep.subr.bf16.mxu1 %v683_v0 }
  0x5b   :  { %527 = vmatpush3.bf16.msra.mxu0 %v526_v38  ;;  %p655_p8 = pnand %p654_p7, %p648_p4 }
  0x5c   :  { %528 = vmatprep.subr.bf16.mxu0 %v683_v0 }
  0x5d   :  { %509 = vmatpush3.bf16.msra.mxu1 %v508_v20 }
  0x5e   :  { %510 = vmatprep.subr.bf16.mxu1 %v683_v0 }
  0x5f   :  { %530 = vmatpush3.bf16.msra.mxu0 %v529_v41 }
  0x60   :  { %531 = vmatprep.subr.bf16.mxu0 %v683_v0 }
  0x61   :  { %512 = vmatpush3.bf16.msra.mxu1 %v511_v23 }
  0x62   :  { %513 = vmatprep.subr.bf16.mxu1 %v683_v0 }
  0x63   :  { %533 = vmatpush3.bf16.msra.mxu0 %v532_v44 }
  0x64   :  { %534 = vmatprep.subr.bf16.mxu0 %v683_v0 }
  0x65   :  { %515 = vmatpush3.bf16.msra.mxu1 %v514_v26 }
  0x66   :  { %516 = vmatprep.subr.bf16.mxu1 %v683_v0 }
  0x67   :  { %536 = vmatpush3.bf16.msra.mxu0 %v535_v52 }
  0x68   :  { %537 = vmatprep.subr.bf16.mxu0 %v683_v0 }
  0x69   :  { %518 = vmatpush3.bf16.msra.mxu1 %v517_v29 }
  0x6b   :  { %539 = vmatpush3.bf16.msra.mxu0 %v538_v55 }
  0x6c   :  { %540 = vmatprep.subr.bf16.mxu0 %v683_v0 }
  0x6f   :  { %542 = vmatpush3.bf16.msra.mxu0 %v541_v58 }
 0x123   :  { %v160_v46 = vpop.f32.mrb[0].mxu0 }
 0x124   :  { %v161_v47 = vadd.f32 %v374_v45, %v160_v46  ;;  %v421_v48 = vpop.f32.mrb[1].mxu0 }
 0x126   :  { %553 = vtanh.f32 %v161_v47 }
 0x130   :  { %v554_v49 = vpop.eup %553 }
 0x131   :  { %455 = vmatmul.mubr.f32.vlgmr.msra.gmra.mrb[0].mxu1 %v554_v49 }
 0x204   :  { %v254_v60 = vpop.f32.mrb[0].mxu1 }
 0x205   :  { %v255_v61 = vadd.f32 %v376_v59, %v254_v60  ;;  %v456_v62 = vpop.f32.mrb[1].mxu1 }
 0x207   :  { %555 = vtanh.f32 %v255_v61 }
 0x211   :  { %v556_v63 = vpop.eup %555 }
 0x212   :  { %490 = vmatmul.mubr.f32.vlgmr.msra.gmra.mrb[2].mxu0 %v556_v63 }
 0x2e5   :  { %v348_v2 = vpop.f32.mrb[2].mxu0 }
 0x2e6   :  { %v349_v3 = vadd.f32 %v377_v1, %v348_v2  ;;  %v491_v4 = vpop.f32.mrb[3].mxu0 }
 0x2e8   :  { %v352_v5 = vmul.f32 0.5, %v349_v3 }
 0x2ea   :  { %557 = vtanh.f32 %v352_v5 }
 0x2f4   :  { %v558_v0 = vpop.eup %557 }
 0x2f5   :  { %v354_v6 = vmul.f32 2.0, %v558_v0 }
 0x2f7   :  { %356 = vst [vmem:[#allocation10] sm:$0xff] %v354_v6 }
 0x2f8   :  { %658 = shalt.err (!%p655_p8)
}
 0x2f9   :  { %s659_s8 = scalar_lea.hbm %s832_s7, 128 }
 0x2fa   :  { %p660_p9 = scmp.ne.s32.totalorder %s832_s7, %s659_s8  ;;  %p663_p10 = scmp.lt.u32.totalorder %s659_s8, %s832_s7 }
 0x2fc   :  { %p665_p11 = pnand %p663_p10, %p660_p9 }
 0x2fe   :  { %668 = shalt.err (!%p665_p11)
}
 0x2ff   :  { %366 = dma.vmem_to_hbm [thread:$0]  %s364_s29, 128, %s832_s7, [#allocation4]  }
 0x300   :  { %675 = dma.done.wait [#allocation4], 128  }
 0x301   :  { %676 = vsyncadd [#allocation4], 4294967168 }
 0x302   :  { %370 = vsyncpa [#allocation3], 1 }
 0x303   :  { %371 = vsyncpa [#allocation6], 1 }
 0x304   :  { %372 = vsyncpa [#allocation9], 1 }
 0x305   :  { %373 = vsyncpa [#allocation4], 1 }

</bundles_post_ra>
